<compile_context>
chip_gen: v5e
topology: v5e:2x2
jax: 0.10.0
libtpu: 0.0.40
codegen_flags: <defaults>
</compile_context>

<pallas_src>
import functools

import jax
import jax.numpy as jnp
from jax import lax
from jax.experimental import pallas as pl
from jax.experimental.pallas import tpu as pltpu


def _scoring_kernel(xq_ref, xk_ref, w1_ref, b1_ref, w2_ref, b2_ref, o_ref):
    """One (batch, q-tile, k-tile) grid step.

    xq_ref: (1, TQ, E)  rows projected through W1 (queries of this tile)
    xk_ref: (1, TK, E)  rows projected through W2 (keys of this tile)
    w*_ref: (E, H)      projection weights (pre-transposed), compute dtype
    b*_ref: (1, H)      biases, f32
    o_ref : (1, TQ, TK) score tile
    """
    xq = xq_ref[0]  # (TQ, E)
    xk = xk_ref[0]  # (TK, E)

    # Projections on the MXU with f32 accumulation; f32 bias add on the VPU.
    h1 = jnp.dot(xq, w1_ref[...], preferred_element_type=jnp.float32) + b1_ref[...]
    h2 = jnp.dot(xk, w2_ref[...], preferred_element_type=jnp.float32) + b2_ref[...]

    # Pairwise bilinear scores: contract the hidden axis directly so the MXU
    # consumes h2 without an explicit transpose.
    scores = lax.dot_general(
        h1.astype(xq.dtype),
        h2.astype(xk.dtype),
        dimension_numbers=(((1,), (1,)), ((), ())),
        preferred_element_type=jnp.float32,
    )  # (TQ, TK) f32
    o_ref[0] = scores.astype(o_ref.dtype)


def _interpolate_linear_last_dim(x: jnp.ndarray, size: int) -> jnp.ndarray:
    """Matches torch.nn.functional.interpolate(x, size=size, mode='linear',
    align_corners=False) on a 3-D tensor (interpolates the last axis)."""
    in_len = x.shape[-1]
    if in_len == size:
        return x
    scale = in_len / size
    out_pos = (jnp.arange(size, dtype=jnp.float32) + 0.5) * scale - 0.5
    out_pos = jnp.clip(out_pos, 0.0, in_len - 1)
    lo = jnp.floor(out_pos).astype(jnp.int32)
    hi = jnp.minimum(lo + 1, in_len - 1)
    frac = out_pos - lo.astype(jnp.float32)
    x_lo = jnp.take(x, lo, axis=-1)
    x_hi = jnp.take(x, hi, axis=-1)
    return x_lo * (1.0 - frac) + x_hi * frac


def _pick_tile(dim: int, target: int) -> int:
    """Largest tile <= target that evenly divides dim (keeps BlockSpecs exact)."""
    t = min(dim, target)
    while dim % t:
        t -= 1
    return t


def scoring_forward(time_embeds, w1, b1, w2, b2, *, embed_size,
                    tq=256, tk=256,
                    compute_dtype=jnp.bfloat16, out_dtype=jnp.float32):
    """time_embeds: (B, S, E_in) f32; w1, w2: (embed_size, H); b1, b2: (H,).

    Returns (B, S, S) scores in out_dtype.
    """
    # Glue: optional linear resize of the embedding axis (plain JAX; jitted
    # together with the kernel so XLA fuses it with the compute-dtype cast).
    if time_embeds.shape[-1] != embed_size:
        time_embeds = _interpolate_linear_last_dim(time_embeds, embed_size)

    B, S, E = time_embeds.shape
    H = w1.shape[1]

    tq = _pick_tile(S, tq)
    tk = _pick_tile(S, tk)
    nq, nk = S // tq, S // tk

    # bf16 operands: ~2x MXU throughput and half the DMA bytes; accumulation
    # stays in f32 via preferred_element_type. Biases stay f32.
    x = time_embeds.astype(compute_dtype)
    w1c = w1.astype(compute_dtype)
    w2c = w2.astype(compute_dtype)
    b1r = b1.astype(jnp.float32).reshape(1, H)
    b2r = b2.astype(jnp.float32).reshape(1, H)

    in_bytes = jnp.dtype(compute_dtype).itemsize
    out_bytes = jnp.dtype(out_dtype).itemsize

    # Rough VMEM footprint: double-buffered xq/xk/output tiles + both weight
    # sets (constant index_map => fetched once, but Pallas reserves 2 buffers
    # each) + h1/h2 intermediates.  Clamp to 48 MiB: above the 16/32 MiB default
    # scoped limit on v5e/v6e, comfortably under v7x's 64 MiB physical VMEM.
    est = (
        2 * (tq + tk) * E * in_bytes            # xq, xk (x2 buffers)
        + 2 * 2 * E * H * in_bytes              # w1, w2 (x2 buffers each)
        + 2 * 2 * H * 4                         # biases
        + 2 * tq * tk * out_bytes               # output tile (x2 buffers)
        + (tq + tk) * H * (4 + in_bytes)        # h1/h2 f32 + cast copies
    )
    vmem_limit = int(min(max(2 * est, 32 * 2**20), 48 * 2**20))
    # NOTE: for very large (E, H), reclaim the dead second weight buffers with
    # pipeline_mode=pl.Buffered(1) on the weight specs or a one-shot manual DMA
    # into scratch (pl.ANY + pltpu.make_async_copy).

    cost = pl.CostEstimate(
        flops=2 * B * S * E * H * (nq + nk) + 2 * B * S * S * H,
        transcendentals=0,
        bytes_accessed=(B * nq * nk * (tq + tk) * E * in_bytes
                        + 2 * E * H * in_bytes + 2 * H * 4
                        + B * S * S * out_bytes),
    )

    grid_spec = pltpu.PrefetchScalarGridSpec(
        num_scalar_prefetch=0,
        grid=(B, nq, nk),
        in_specs=[
            pl.BlockSpec((1, tq, E), lambda b, qi, ki: (b, qi, 0)),   # q rows
            pl.BlockSpec((1, tk, E), lambda b, qi, ki: (b, ki, 0)),   # k rows
            pl.BlockSpec((E, H), lambda b, qi, ki: (0, 0)),           # W1^T
            pl.BlockSpec((1, H), lambda b, qi, ki: (0, 0)),           # b1
            pl.BlockSpec((E, H), lambda b, qi, ki: (0, 0)),           # W2^T
            pl.BlockSpec((1, H), lambda b, qi, ki: (0, 0)),           # b2
        ],
        out_specs=pl.BlockSpec((1, tq, tk), lambda b, qi, ki: (b, qi, ki)),
    )

    return pl.pallas_call(
        _scoring_kernel,
        out_shape=jax.ShapeDtypeStruct((B, S, S), out_dtype),
        grid_spec=grid_spec,
        compiler_params=pltpu.CompilerParams(
            # No reduction axis: every grid point owns its own output tile, so
            # all three axes can be split across TensorCores (v7x megacore).
            dimension_semantics=("parallel", "parallel", "parallel"),
            vmem_limit_bytes=vmem_limit,
        ),
        cost_estimate=cost,
    )(x, x, w1c, b1r, w2c, b2r)


def _reference(time_embeds, w1, b1, w2, b2, *, embed_size,
               compute_dtype=jnp.float32):
    """Pure-JAX reference.  compute_dtype=f32 reproduces the PyTorch module
    exactly; compute_dtype=bf16 mirrors the kernel's MXU operand precision."""
    if time_embeds.shape[-1] != embed_size:
        time_embeds = _interpolate_linear_last_dim(time_embeds, embed_size)
    xc = time_embeds.astype(compute_dtype)
    h1 = (jnp.dot(xc, w1.astype(compute_dtype), preferred_element_type=jnp.float32)
          + b1.astype(jnp.float32))
    h2 = (jnp.dot(xc, w2.astype(compute_dtype), preferred_element_type=jnp.float32)
          + b2.astype(jnp.float32))
    h1 = h1.astype(compute_dtype)
    h2 = h2.astype(compute_dtype)
    return jnp.einsum("bsh,bth->bst", h1, h2,
                      preferred_element_type=jnp.float32).astype(jnp.float32)


if __name__ == "__main__":
    # Small but lane-aligned shapes: S and H multiples of 128 fill the 128-lane
    # vregs and avoid masked partial stores (a tiny S=8 case would leave the MXU
    # >99% idle and is better served by plain XLA).
    batch, seq_len, embed_size, hidden_size = 2, 256, 128, 128

    key = jax.random.PRNGKey(0)
    k_x, k_w1, k_b1, k_w2, k_b2, k_x2 = jax.random.split(key, 6)

    time_embeds = jax.random.normal(k_x, (batch, seq_len, embed_size), jnp.float32)

    # nn.Linear-style init; PyTorch weight is (hidden, embed) -- we store the
    # transpose (embed, hidden) so the kernel does row-major X @ W.
    bound = 1.0 / (embed_size ** 0.5)
    w1 = jax.random.uniform(k_w1, (embed_size, hidden_size), jnp.float32, -bound, bound)
    b1 = jax.random.uniform(k_b1, (hidden_size,), jnp.float32, -bound, bound)
    w2 = jax.random.uniform(k_w2, (embed_size, hidden_size), jnp.float32, -bound, bound)
    b2 = jax.random.uniform(k_b2, (hidden_size,), jnp.float32, -bound, bound)

    # Case 1: multi-tile grid (B, S/128, S/128) = (2, 2, 2).
    run = jax.jit(functools.partial(scoring_forward, embed_size=embed_size,
                                    tq=128, tk=128))
    scores = run(time_embeds, w1, b1, w2, b2)
    jax.block_until_ready(scores)
    assert scores.shape == (batch, seq_len, seq_len)
    assert scores.dtype == jnp.float32

    # Strict check against a reference using the same MXU operand precision
    # (bf16 operands, f32 accumulation).
    ref_bf16 = _reference(time_embeds, w1, b1, w2, b2, embed_size=embed_size,
                          compute_dtype=jnp.bfloat16)
    assert jnp.allclose(scores, ref_bf16, atol=1e-2, rtol=1e-2)

    # Sanity check against the exact f32 module semantics (bf16-level tolerance).
    ref_f32 = _reference(time_embeds, w1, b1, w2, b2, embed_size=embed_size,
                         compute_dtype=jnp.float32)
    assert jnp.allclose(scores, ref_f32, atol=0.15, rtol=0.05)

    # Case 2: input embed width != embed_size exercises the interpolate path;
    # default (256, 256) tiles collapse to one (q, k) tile per batch element.
    te2 = jax.random.normal(k_x2, (batch, seq_len, 96), jnp.float32)
    run2 = jax.jit(functools.partial(scoring_forward, embed_size=embed_size))
    scores2 = run2(te2, w1, b1, w2, b2)
    jax.block_until_ready(scores2)
    ref2 = _reference(te2, w1, b1, w2, b2, embed_size=embed_size,
                      compute_dtype=jnp.bfloat16)
    assert scores2.shape == (batch, seq_len, seq_len)
    assert jnp.allclose(scores2, ref2, atol=1e-2, rtol=1e-2)

    print("KERNEL_OK")
</pallas_src>

<mosaic_0001>
module attributes {stable_mosaic.version = 11 : i64} {
  func.func @_scoring_kernel(%arg0: i32, %arg1: i32, %arg2: i32, %arg3: memref<1x128x128xbf16, #tpu.memory_space<vmem>>, %arg4: memref<1x128x128xbf16, #tpu.memory_space<vmem>>, %arg5: memref<128x128xbf16, #tpu.memory_space<vmem>>, %arg6: memref<1x128xf32, #tpu.memory_space<vmem>>, %arg7: memref<128x128xbf16, #tpu.memory_space<vmem>>, %arg8: memref<1x128xf32, #tpu.memory_space<vmem>>, %arg9: memref<1x128x128xf32, #tpu.memory_space<vmem>>) attributes {dimension_semantics = [#tpu.dimension_semantics<parallel>, #tpu.dimension_semantics<parallel>, #tpu.dimension_semantics<parallel>], iteration_bounds = array<i64: 2, 2, 2>, scalar_prefetch = 0 : i64, scratch_operands = 0 : i64, tpu.core_type = #tpu.core_type<tc>, window_params = [{transform_indices = @transform_0, window_bounds = array<i64: 1, 128, 128>}, {transform_indices = @transform_1, window_bounds = array<i64: 1, 128, 128>}, {pipeline_mode = #tpu.pipeline_mode<synchronous>, transform_indices = @transform_2, window_bounds = array<i64: 128, 128>}, {pipeline_mode = #tpu.pipeline_mode<synchronous>, transform_indices = @transform_3, window_bounds = array<i64: 1, 128>}, {pipeline_mode = #tpu.pipeline_mode<synchronous>, transform_indices = @transform_4, window_bounds = array<i64: 128, 128>}, {pipeline_mode = #tpu.pipeline_mode<synchronous>, transform_indices = @transform_5, window_bounds = array<i64: 1, 128>}, {transform_indices = @transform_6, window_bounds = array<i64: 1, 128, 128>}]} {
    %c0 = arith.constant 0 : index
    %c0_0 = arith.constant 0 : index
    %c0_1 = arith.constant 0 : index
    %0 = vector.load %arg3[%c0, %c0_0, %c0_1] : memref<1x128x128xbf16, #tpu.memory_space<vmem>>, vector<1x128x128xbf16>
    %1 = vector.shape_cast %0 : vector<1x128x128xbf16> to vector<128x128xbf16>
    %c0_2 = arith.constant 0 : index
    %c0_3 = arith.constant 0 : index
    %c0_4 = arith.constant 0 : index
    %2 = vector.load %arg4[%c0_2, %c0_3, %c0_4] : memref<1x128x128xbf16, #tpu.memory_space<vmem>>, vector<1x128x128xbf16>
    %3 = vector.shape_cast %2 : vector<1x128x128xbf16> to vector<128x128xbf16>
    %c0_5 = arith.constant 0 : index
    %c0_6 = arith.constant 0 : index
    %4 = vector.load %arg5[%c0_5, %c0_6] : memref<128x128xbf16, #tpu.memory_space<vmem>>, vector<128x128xbf16>
    %cst = arith.constant dense<0.000000e+00> : vector<128x128xf32>
    %5 = tpu.matmul %1, %4, %cst {dimension_numbers = #tpu.dot_dimension_numbers<[1], [0], [0], [1], [0, 0, 1, 1], [], []>} : vector<128x128xbf16>, vector<128x128xbf16>, vector<128x128xf32> -> vector<128x128xf32>
    %c0_7 = arith.constant 0 : index
    %c0_8 = arith.constant 0 : index
    %6 = vector.load %arg6[%c0_7, %c0_8] : memref<1x128xf32, #tpu.memory_space<vmem>>, vector<1x128xf32>
    %7 = vector.broadcast %6 : vector<1x128xf32> to vector<128x128xf32>
    %8 = arith.addf %5, %7 : vector<128x128xf32>
    %c0_9 = arith.constant 0 : index
    %c0_10 = arith.constant 0 : index
    %9 = vector.load %arg7[%c0_9, %c0_10] : memref<128x128xbf16, #tpu.memory_space<vmem>>, vector<128x128xbf16>
    %cst_11 = arith.constant dense<0.000000e+00> : vector<128x128xf32>
    %10 = tpu.matmul %3, %9, %cst_11 {dimension_numbers = #tpu.dot_dimension_numbers<[1], [0], [0], [1], [0, 0, 1, 1], [], []>} : vector<128x128xbf16>, vector<128x128xbf16>, vector<128x128xf32> -> vector<128x128xf32>
    %c0_12 = arith.constant 0 : index
    %c0_13 = arith.constant 0 : index
    %11 = vector.load %arg8[%c0_12, %c0_13] : memref<1x128xf32, #tpu.memory_space<vmem>>, vector<1x128xf32>
    %12 = vector.broadcast %11 : vector<1x128xf32> to vector<128x128xf32>
    %13 = arith.addf %10, %12 : vector<128x128xf32>
    %14 = arith.truncf %8 : vector<128x128xf32> to vector<128x128xbf16>
    %15 = arith.truncf %13 : vector<128x128xf32> to vector<128x128xbf16>
    %cst_14 = arith.constant dense<0.000000e+00> : vector<128x128xf32>
    %16 = tpu.matmul %14, %15, %cst_14 {dimension_numbers = #tpu.dot_dimension_numbers<[1], [1], [0], [0], [0, 0, 1, 0], [], []>} : vector<128x128xbf16>, vector<128x128xbf16>, vector<128x128xf32> -> vector<128x128xf32>
    %c0_15 = arith.constant 0 : index
    %c0_16 = arith.constant 0 : index
    %c0_17 = arith.constant 0 : index
    %17 = vector.load %arg9[%c0_15, %c0_16, %c0_17] : memref<1x128x128xf32, #tpu.memory_space<vmem>>, vector<1x128x128xf32>
    %18 = vector.shape_cast %17 : vector<1x128x128xf32> to vector<128x128xf32>
    %19 = vector.shape_cast %16 : vector<128x128xf32> to vector<1x128x128xf32>
    tpu.vector_store %arg9[%c0_15, %c0_16, %c0_17], %19 {strides = array<i32>} : memref<1x128x128xf32, #tpu.memory_space<vmem>>, vector<1x128x128xf32>,
    return
  }
  func.func @transform_0(%arg0: i32, %arg1: i32, %arg2: i32) -> (i32, i32, i32) {
    %c0_i32 = arith.constant 0 : i32
    %c0_i32_0 = arith.constant 0 : i32
    return %arg0, %arg1, %c0_i32 : i32, i32, i32
  }
  func.func @transform_1(%arg0: i32, %arg1: i32, %arg2: i32) -> (i32, i32, i32) {
    %c0_i32 = arith.constant 0 : i32
    %c0_i32_0 = arith.constant 0 : i32
    return %arg0, %arg2, %c0_i32 : i32, i32, i32
  }
  func.func @transform_2(%arg0: i32, %arg1: i32, %arg2: i32) -> (i32, i32) {
    %c0_i32 = arith.constant 0 : i32
    %c0_i32_0 = arith.constant 0 : i32
    %c0_i32_1 = arith.constant 0 : i32
    return %c0_i32, %c0_i32_0 : i32, i32
  }
  func.func @transform_3(%arg0: i32, %arg1: i32, %arg2: i32) -> (i32, i32) {
    %c0_i32 = arith.constant 0 : i32
    %c0_i32_0 = arith.constant 0 : i32
    %c0_i32_1 = arith.constant 0 : i32
    return %c0_i32, %c0_i32_0 : i32, i32
  }
  func.func @transform_4(%arg0: i32, %arg1: i32, %arg2: i32) -> (i32, i32) {
    %c0_i32 = arith.constant 0 : i32
    %c0_i32_0 = arith.constant 0 : i32
    %c0_i32_1 = arith.constant 0 : i32
    return %c0_i32, %c0_i32_0 : i32, i32
  }
  func.func @transform_5(%arg0: i32, %arg1: i32, %arg2: i32) -> (i32, i32) {
    %c0_i32 = arith.constant 0 : i32
    %c0_i32_0 = arith.constant 0 : i32
    %c0_i32_1 = arith.constant 0 : i32
    return %c0_i32, %c0_i32_0 : i32, i32
  }
  func.func @transform_6(%arg0: i32, %arg1: i32, %arg2: i32) -> (i32, i32, i32) {
    %c0_i32 = arith.constant 0 : i32
    return %arg0, %arg1, %arg2 : i32, i32, i32
  }
}

</mosaic_0001>

<bundles_post_ra>
// kernel: scoring_forward.1
= control target key start
LH: loop header
LB: loop body
LE: loop exit
PB: predicated region body
PF: predicated region fallthrough
CT: control target
= control target key end

     0   :  { %s1626_s0 = inlined_call_operand.vmem [shape: bf16[2,256,128], index: 0, kind: input, shape index: {}, may-alias: {0,1}]   ;;  %s1627_s1 = inlined_call_operand.vmem [shape: bf16[2,256,128], index: 1, kind: input, shape index: {}, may-alias: {0,1}]   ;;  %s1628_s2 = inlined_call_operand.vmem [shape: bf16[128,128], index: 2, kind: input, shape index: {}]   ;;  %s1629_s3 = inlined_call_operand.vmem [shape: f32[1,128], index: 3, kind: input, shape index: {}]   ;;  %s1630_s4 = inlined_call_operand.vmem [shape: bf16[128,128], index: 4, kind: input, shape index: {}]   ;;  %s1631_s5 = inlined_call_operand.vmem [shape: f32[1,128], index: 5, kind: input, shape index: {}]   ;;  %s1632_s6 = inlined_call_operand.hbm [shape: f32[2,256,256], index: 6, kind: output, shape index: {}]  }
   0x1   :  { %1639 = sst [smem:[#allocation11_spill]] %s1627_s1 }
   0x2   :  { %11 = vsyncpa [#allocation3], 0 }
   0x3   :  { %13 = vsyncpa [#allocation3 + $0x1], 0  ;;  %s1326_s21 = smov 0   ;;  %s1328_s22 = smov 0  }
   0x4   :  { %s1330_s23 = smov 0   ;;  %s1332_s24 = smov 0  }
   0x5   :  { %s1334_s25 = smov 0   ;;  %s1336_s26 = smov 0  }
   0x6   :  { %s1338_s27 = smov 0   ;;  %s1340_s28 = smov 0  }
   0x7   :  { %s1342_s29 = smov 0   ;;  %s1344_s30 = smov 0  }
   0x8 LB: > { %1640 = sst [smem:[#allocation5_spill]] %s1274_s27  ;;  %s896_s7 = sadd.s32 4294967295, %s1286_s30   ;;  %s1286_s30 = sphi %s1344_s30, %s19_s30   ;;  %s1282_s29 = sphi %s1342_s29, %s1654_s29   ;;  %s1278_s28 = sphi %s1340_s28, %s1653_s28   ;;  %s1274_s27 = sphi %s1338_s27, %s1652_s27   ;;  %s1270_s26 = sphi %s1336_s26, %s1651_s26   ;;  %s1266_s25 = sphi %s1334_s25, %s1650_s25   ;;  %s1262_s24 = sphi %s1332_s24, %s1649_s24   ;;  %s1258_s23 = sphi %s1330_s23, %s1657_s23   ;;  %s1254_s22 = sphi %s1328_s22, %s1656_s22   ;;  %s1250_s21 = sphi %s1326_s21, %s1655_s21  }
   0x9   : > { %1641 = sst [smem:[#allocation6_spill]] %s1278_s28  ;;  %s31_s8 = sadd.s32 1, %s1274_s27 }
   0xa   : > { %1642 = sst [smem:[#allocation7_spill]] %s1282_s29  ;;  %p32_p0 = scmp.ge.s32.totalorder %s31_s8, 2 }
   0xb   : > { %s34_s9 = sadd.s32 1, %s1278_s28  ;;  %s897_s10 = sadd.s32 4294967294, %s1286_s30  }
   0xc   : > { %p199_p1 = scmp.ne.s32.totalorder %s1258_s23, %s1254_s22  ;;  %s1659_s8 = smov (%p32_p0, %s31_s8), 0 }
   0xd   : > { %1643 = sst [smem:[#allocation8_spill]] %s1659_s8  ;;  %s1661_s9 = smov (!%p32_p0, %s34_s9), %s1278_s28 }
   0xe   : > { %s38_s11 = sadd.s32 1, %s1282_s29  ;;  %p200_p2 = scmp.eq.s32.totalorder %s896_s7, 7 }
   0xf   : > { %p36_p3 = scmp.ge.s32.totalorder %s1661_s9, 2  ;;  %p205_p4 = scmp.ne.s32.totalorder %s1254_s22, %s1250_s21 }
  0x10   : > { %p1388_p5 = por %p200_p2, %p199_p1  ;;  %p206_p6 = scmp.eq.s32.totalorder %s897_s10, 7 }
  0x11   : > { %s1663_s9 = smov (%p36_p3, %s1661_s9), 0  ;;  %s1665_s11 = smov (!%p36_p3, %s38_s11), %s1282_s29 }
  0x12   : > { %1645 = sst [smem:[#allocation9_spill]] %s1663_s9  ;;  %p1395_p7 = por %p206_p6, %p205_p4 }
  0x13   : > { %p40_p8 = scmp.ge.s32.totalorder %s1665_s11, 2  ;;  %p900_p9 = scmp.ge.s32.totalorder %s1286_s30, 1 }
  0x14   : > { %s183_s14 = ssub.s32 %s1278_s28, %s1663_s9  ;;  %p262_p10 = scmp.lt.s32.totalorder %s1286_s30, 9 }
  0x15   : > { %s1667_s11 = smov (%p40_p8, %s1665_s11), 0  ;;  %s185_s15 = ssub.s32 %s1274_s27, %s1659_s8 }
  0x16   : > { %1647 = sst [smem:[#allocation10_spill]] %s1667_s11  ;;  %p263_p11 = pnand %p900_p9, %p262_p10 }
  0x17   : > { %s182_s16 = ssub.s32 %s1282_s29, %s1667_s11  ;;  %s189_s19 = sadd.s32 1, %s1258_s23 }
  0x18   : > { %s184_s17 = sor.u32 %s183_s14, %s182_s16  ;;  %266 = sbr.rel (%p263_p11) target bundleno = 583 (0x247), region = 44 }
  0x19   : > { %s186_s18 = sor.u32 %s185_s15, %s184_s17  ;;  %p306_p13 = scmp.lt.s32.totalorder (!%p263_p11), %s1270_s26, 1 }
  0x1a   : > { %p187_p12 = scmp.eq.s32.totalorder %s186_s18, 0  ;;  %s905_s16 = sshll.u32 (!%p263_p11), %s1262_s24, 4 }
  0x1b   : > { %p318_p0 = scmp.lt.s32.totalorder (!%p263_p11), %s905_s16, 31  ;;  %s1648_s1 = sld [smem:[#allocation11_spill]] (!%p263_p11) }
  0x1c   : > { %s1411_s20 = scalar_select %p187_p12, %s1258_s23, %s189_s19  }
  0x1d   : > { %v1074_v0 = vld [vmem:[%s1630_s4 + $0x38] sm:$0xff]  ;;  %v1073_v1 = vld [vmem:[%s1630_s4 + $0x30] sm:$0xff]  ;;  %v1072_v2 = vld [vmem:[%s1630_s4 + $0x28] sm:$0xff]  ;;  %s1428_s19 = scalar_select %p306_p13, %s1270_s26, 1 }
  0x1e   : > { %639 = vmatpush.bf16.msra.mxu1 %v1074_v0  ;;  %v1071_v3 = vld [vmem:[%s1630_s4 + $0x20] sm:$0xff]  ;;  %v1070_v4 = vld [vmem:[%s1630_s4 + $0x18] sm:$0xff]  ;;  %s1669_s16 = smov (!%p318_p0, %s905_s16), 31  ;;  %v1069_v5 = vld [vmem:[%s1630_s4 + $0x10] sm:$0xff]  ;;  %s1039_s10 = sshll.u32 %s1270_s26, 6 }
  0x1f   : > { %s903_s7 = sshll.u32 %s1428_s19, 5  ;;  %v1068_v6 = vld [vmem:[%s1630_s4 + $0x8] sm:$0xff]  ;;  %v1067_v7 = vld [vmem:[%s1630_s4] sm:$0xff]  ;;  %v1066_v11 = vld [vmem:[%s1628_s2 + $0x38] sm:$0xff] }
  0x20   : > { %s321_s15 = sadd.s32 %s903_s7, %s1669_s16  ;;  %474 = vmatpush.bf16.msra.mxu0 %v1066_v11  ;;  %v1065_v13 = vld [vmem:[%s1628_s2 + $0x30] sm:$0xff]  ;;  %v1064_v14 = vld [vmem:[%s1628_s2 + $0x28] sm:$0xff]  ;;  %v1063_v15 = vld [vmem:[%s1628_s2 + $0x20] sm:$0xff] }
  0x21   : > { %s907_s11 = sshll.u32 %s321_s15, 2  ;;  %s902_s15 = sshll.u32 %s1266_s25, 4  ;;  %v1062_v16 = vld [vmem:[%s1628_s2 + $0x18] sm:$0xff]  ;;  %v1061_v18 = vld [vmem:[%s1628_s2 + $0x10] sm:$0xff]  ;;  %v1060_v19 = vld [vmem:[%s1628_s2 + $0x8] sm:$0xff] }
  0x22   : > { %640 = vmatpush.bf16.msra.mxu1 %v1073_v1  ;;  %s1448_s27 = scalar_lea.vmem %s1648_s1, %s907_s11  ;;  %p308_p1 = scmp.lt.s32.totalorder %s902_s15, 31  ;;  %v1059_v20 = vld [vmem:[%s1628_s2] sm:$0xff] }
  0x23   : > { %v1051_v8 = vld [vmem:[%s1448_s27] sm:$0xff]  ;;  %v1052_v9 = vld [vmem:[%s1448_s27 + $0x8] sm:$0xff]  ;;  %v1053_v10 = vld [vmem:[%s1448_s27 + $0x10] sm:$0xff] }
  0x24   : > { %v1054_v12 = vld [vmem:[%s1448_s27 + $0x18] sm:$0xff]  ;;  %475 = vmatpush.bf16.msra.mxu0 %v1065_v13  ;;  %v1055_v17 = vld [vmem:[%s1448_s27 + $0x20] sm:$0xff]  ;;  %s1671_s15 = smov (!%p308_p1, %s902_s15), 31  ;;  %v1056_v22 = vld [vmem:[%s1448_s27 + $0x28] sm:$0xff] }
  0x25   : > { %s311_s11 = sadd.s32 %s903_s7, %s1671_s15  ;;  %v1057_v23 = vld [vmem:[%s1448_s27 + $0x30] sm:$0xff]  ;;  %v1058_v25 = vld [vmem:[%s1448_s27 + $0x38] sm:$0xff]  ;;  %v1497_v29 = vld [vmem:[%s1631_s5] ss:$0 sm:$0xff] }
  0x26   : > { %641 = vmatpush.bf16.msra.mxu1 %v1072_v2  ;;  %s904_s14 = sshll.u32 %s311_s11, 2  ;;  %v1522_v62 = vld [vmem:[%s1629_s3] ss:$0 sm:$0xff]  ;;  %s1075_s11 = sshll.u32 %s1266_s25, 5 }
  0x27   : > { %s1485_s1 = scalar_lea.vmem %s1626_s0, %s904_s14  ;;  %s781_s16 = sadd.s32 %s1262_s24, %s1075_s11 }
  0x28   : > { %476 = vmatpush.bf16.msra.mxu0 %v1064_v14  ;;  %v1043_v21 = vld [vmem:[%s1485_s1] sm:$0xff]  ;;  %v1044_v24 = vld [vmem:[%s1485_s1 + $0x8] sm:$0xff]  ;;  %v1045_v26 = vld [vmem:[%s1485_s1 + $0x10] sm:$0xff]  ;;  %s783_s14 = sadd.s32 %s1039_s10, %s781_s16 }
  0x29   : > { %v1046_v28 = vld [vmem:[%s1485_s1 + $0x18] sm:$0xff]  ;;  %v1047_v35 = vld [vmem:[%s1485_s1 + $0x20] sm:$0xff]  ;;  %v1048_v41 = vld [vmem:[%s1485_s1 + $0x28] sm:$0xff]  ;;  %s1040_s17 = sshll.u32 %s783_s14, 3 }
  0x2a   : > { %642 = vmatpush.bf16.msra.mxu1 %v1071_v3  ;;  %v1049_v47 = vld [vmem:[%s1485_s1 + $0x30] sm:$0xff]  ;;  %v1050_v53 = vld [vmem:[%s1485_s1 + $0x38] sm:$0xff]  ;;  %s302_s1 = sand.u32 1, %s1254_s22   ;;  %s785_s9 = scalar_lea.hbm %s1632_s6, %s1040_s17 }
  0x2b   : > { %s901_s29 = sshll.u32 %s302_s1, 7  ;;  %s788_s7 = sshll.u32 %s785_s9, 4  ;;  %s789_s7 = int_to_ptr.hbm [resolvable:$true] %s788_s7 }
  0x2c   : > { %477 = vmatpush.bf16.msra.mxu0 %v1063_v15  ;;  %s1555_s8 = scalar_lea.vmem [#allocation2], %s901_s29  ;;  %s770_s24 = scalar_lea.sflag [#allocation3], %s302_s1 }
  0x2d   : > { %s786_s19 = sshll.u32 %s1555_s8, 4  ;;  %s1190_s25 = sshra.s32 %s789_s7, 4  ;;  %s787_s19 = int_to_ptr.vmem [resolvable:$true] %s786_s19  ;;  %s1191_s25 = int_to_ptr.hbm [resolvable:$true] %s1190_s25 }
  0x2e   : > { %643 = vmatpush.bf16.msra.mxu1 %v1070_v4  ;;  %s1192_s26 = scalar_lea.hbm %s1191_s25, 128  ;;  %s1196_s29 = scalar_lea.hbm %s1632_s6, 1024 }
  0x2f   : > { %p1193_p2 = scmp.ne.s32.totalorder %s1191_s25, %s1192_s26  ;;  %p1197_p6 = scmp.lt.s32.totalorder %s1191_s25, %s1632_s6 }
  0x30   : > { %478 = vmatpush.bf16.msra.mxu0 %v1062_v16  ;;  %p1198_p8 = scmp.lt.s32.totalorder %s1196_s29, %s1192_s26 }
  0x31   : > { %p1194_p3 = pnand %p1193_p2, %p1388_p5 }
  0x32   : > { %644 = vmatpush.bf16.msra.mxu1 %v1069_v5  ;;  %p1199_p9 = por %p1198_p8, %p1197_p6 }
  0x33   : > { %p1195_p4 = pneg %p1194_p3 }
  0x34   : > { %479 = vmatpush.bf16.msra.mxu0 %v1061_v18 }
  0x35   : > { %p1200_p10 = pnand %p1199_p9, %p1195_p4 }
  0x36   : > { %645 = vmatpush.bf16.msra.mxu1 %v1068_v6 }
  0x38   : > { %480 = vmatpush.bf16.msra.mxu0 %v1060_v19 }
  0x3a   : > { %646 = vmatpush.bf16.msra.mxu1 %v1067_v7 }
  0x3c   : > { %481 = vmatpush.bf16.msra.mxu0 %v1059_v20 }
  0x3d   : > { %647 = vmatmul.bf16.vlgmr.msra.gmra.mxu1 %v1051_v8 }
  0x3f   : > { %482 = vmatmul.bf16.vlgmr.msra.gmra.mxu0 %v1043_v21 }
  0x4d   : > { %652 = vmatmul.bf16.gmra.mxu1 %v1052_v9 }
  0x4f   : > { %487 = vmatmul.bf16.gmra.mxu0 %v1044_v24 }
  0x5d   : > { %657 = vmatmul.bf16.gmra.mxu1 %v1053_v10 }
  0x5f   : > { %492 = vmatmul.bf16.gmra.mxu0 %v1045_v26 }
  0x6d   : > { %662 = vmatmul.bf16.gmra.mxu1 %v1054_v12 }
  0x6f   : > { %497 = vmatmul.bf16.gmra.mxu0 %v1046_v28 }
  0x7d   : > { %667 = vmatmul.bf16.gmra.mxu1 %v1055_v17 }
  0x7f   : > { %502 = vmatmul.bf16.gmra.mxu0 %v1047_v35 }
  0x8d   : > { %672 = vmatmul.bf16.gmra.mxu1 %v1056_v22 }
  0x8f   : > { %507 = vmatmul.bf16.gmra.mxu0 %v1048_v41 }
  0x9d   : > { %677 = vmatmul.bf16.gmra.mxu1 %v1057_v23 }
  0x9f   : > { %512 = vmatmul.bf16.gmra.mxu0 %v1049_v47 }
  0xad   : > { %682 = vmatmul.bf16.gmra.mxu1 %v1058_v25 }
  0xaf   : > { %517 = vmatmul.bf16.gmra.mxu0 %v1050_v53 }
  0xba   : > { %v648_v27 = vpop.f32.mrf.mxu1 }
  0xbb   : > { %v649_v31 = vadd.f32 %v1497_v29, %v648_v27 }
  0xbc   : > { %v483_v58 = vpop.f32.mrf.mxu0 }
  0xbd   : > { %v484_v63 = vadd.f32 %v1522_v62, %v483_v58 }
  0xc2   : > { %v650_v30 = vpop.f32.mrf.mxu1 }
  0xc3   : > { %v651_v32 = vadd.f32 %v1497_v29, %v650_v30 }
  0xc4   : > { %v485_v60 = vpop.f32.mrf.mxu0 }
  0xc5   : > { %v1501_v33 = vpack.c.bf16 %v651_v32, %v649_v31  ;;  %v486_v0 = vadd.f32 %v1522_v62, %v485_v60 }
  0xc7   : > { %v688_v3 = vpack.c.bf16 %v486_v0, %v484_v63 }
  0xca   : > { %v653_v34 = vpop.f32.mrf.mxu1 }
  0xcb   : > { %v654_v37 = vadd.f32 %v1497_v29, %v653_v34 }
  0xcc   : > { %v488_v1 = vpop.f32.mrf.mxu0 }
  0xcd   : > { %v489_v6 = vadd.f32 %v1522_v62, %v488_v1 }
  0xd2   : > { %v655_v36 = vpop.f32.mrf.mxu1 }
  0xd3   : > { %v656_v38 = vadd.f32 %v1497_v29, %v655_v36 }
  0xd4   : > { %v490_v4 = vpop.f32.mrf.mxu0 }
  0xd5   : > { %v1506_v39 = vpack.c.bf16 %v656_v38, %v654_v37  ;;  %v491_v7 = vadd.f32 %v1522_v62, %v490_v4 }
  0xd7   : > { %v689_v10 = vpack.c.bf16 %v491_v7, %v489_v6 }
  0xda   : > { %v658_v40 = vpop.f32.mrf.mxu1 }
  0xdb   : > { %v659_v43 = vadd.f32 %v1497_v29, %v658_v40 }
  0xdc   : > { %v493_v8 = vpop.f32.mrf.mxu0 }
  0xdd   : > { %v494_v16 = vadd.f32 %v1522_v62, %v493_v8 }
  0xe2   : > { %v660_v42 = vpop.f32.mrf.mxu1 }
  0xe3   : > { %v661_v44 = vadd.f32 %v1497_v29, %v660_v42 }
  0xe4   : > { %v495_v11 = vpop.f32.mrf.mxu0 }
  0xe5   : > { %v1511_v45 = vpack.c.bf16 %v661_v44, %v659_v43  ;;  %v496_v17 = vadd.f32 %v1522_v62, %v495_v11 }
  0xe7   : > { %v690_v21 = vpack.c.bf16 %v496_v17, %v494_v16 }
  0xea   : > { %v663_v46 = vpop.f32.mrf.mxu1 }
  0xeb   : > { %v664_v49 = vadd.f32 %v1497_v29, %v663_v46 }
  0xec   : > { %v498_v19 = vpop.f32.mrf.mxu0 }
  0xed   : > { %v499_v27 = vadd.f32 %v1522_v62, %v498_v19 }
  0xf2   : > { %v665_v48 = vpop.f32.mrf.mxu1 }
  0xf3   : > { %v666_v50 = vadd.f32 %v1497_v29, %v665_v48 }
  0xf4   : > { %v500_v24 = vpop.f32.mrf.mxu0 }
  0xf5   : > { %v699_v51 = vpack.c.bf16 %v666_v50, %v664_v49  ;;  %v501_v28 = vadd.f32 %v1522_v62, %v500_v24 }
  0xf7   : > { %v691_v32 = vpack.c.bf16 %v501_v28, %v499_v27 }
  0xfa   : > { %v668_v52 = vpop.f32.mrf.mxu1 }
  0xfb   : > { %v669_v55 = vadd.f32 %v1497_v29, %v668_v52 }
  0xfc   : > { %v503_v30 = vpop.f32.mrf.mxu0 }
  0xfd   : > { %v504_v31 = vadd.f32 %v1522_v62, %v503_v30 }
 0x102   : > { %v670_v54 = vpop.f32.mrf.mxu1 }
 0x103   : > { %v671_v56 = vadd.f32 %v1497_v29, %v670_v54 }
 0x104   : > { %v505_v34 = vpop.f32.mrf.mxu0 }
 0x105   : > { %v700_v57 = vpack.c.bf16 %v671_v56, %v669_v55  ;;  %v506_v35 = vadd.f32 %v1522_v62, %v505_v34 }
 0x10a   : > { %v673_v59 = vpop.f32.mrf.mxu1 }
 0x10b   : > { %v674_v25 = vadd.f32 %v1497_v29, %v673_v59 }
 0x10c   : > { %v508_v36 = vpop.f32.mrf.mxu0 }
 0x10d   : > { %v509_v40 = vadd.f32 %v1522_v62, %v508_v36 }
 0x112   : > { %v675_v61 = vpop.f32.mrf.mxu1 }
 0x113   : > { %v676_v23 = vadd.f32 %v1497_v29, %v675_v61 }
 0x114   : > { %v510_v37 = vpop.f32.mrf.mxu0 }
 0x115   : > { %v701_v26 = vpack.c.bf16 %v676_v23, %v674_v25  ;;  %v511_v41 = vadd.f32 %v1522_v62, %v510_v37 }
 0x117   : > { %v693_v42 = vpack.c.bf16 %v511_v41, %v509_v40 }
 0x11a   : > { %v678_v2 = vpop.f32.mrf.mxu1 }
 0x11b   : > { %v679_v20 = vadd.f32 %v1497_v29, %v678_v2 }
 0x11c   : > { %v513_v38 = vpop.f32.mrf.mxu0 }
 0x11d   : > { %v514_v44 = vadd.f32 %v1522_v62, %v513_v38 }
 0x122   : > { %v680_v5 = vpop.f32.mrf.mxu1 }
 0x123   : > { %v681_v18 = vadd.f32 %v1497_v29, %v680_v5 }
 0x124   : > { %v515_v43 = vpop.f32.mrf.mxu0 }
 0x125   : > { %v702_v22 = vpack.c.bf16 %v681_v18, %v679_v20 }
 0x12a   : > { %v683_v9 = vpop.f32.mrf.mxu1 }
 0x12b   : > { %v684_v13 = vadd.f32 %v1497_v29, %v683_v9 }
 0x132   : > { %v685_v12 = vpop.f32.mrf.mxu1 }
 0x133   : > { %v686_v14 = vadd.f32 %v1497_v29, %v685_v12  ;;  %v692_v29 = vpack.c.bf16 %v506_v35, %v504_v31 }
 0x135   : > { %v703_v15 = vpack.c.bf16 %v686_v14, %v684_v13 }
 0x137   : > { %704 = vmatpush.bf16.xpose.msra.mxu2 %v703_v15  ;;  %1076 = vmatpush.bf16.xpose.msra.mxu3 %v703_v15 }
 0x13f   : > { %705 = vmatpush.bf16.xpose.msra.mxu2 %v702_v22  ;;  %1077 = vmatpush.bf16.xpose.msra.mxu3 %v702_v22 }
 0x147   : > { %706 = vmatpush.bf16.xpose.msra.mxu2 %v701_v26  ;;  %1078 = vmatpush.bf16.xpose.msra.mxu3 %v701_v26 }
 0x14f   : > { %707 = vmatpush.bf16.xpose.msra.mxu2 %v700_v57  ;;  %1079 = vmatpush.bf16.xpose.msra.mxu3 %v700_v57 }
 0x157   : > { %708 = vmatpush.bf16.xpose.msra.mxu2 %v699_v51  ;;  %1080 = vmatpush.bf16.xpose.msra.mxu3 %v699_v51 }
 0x15f   : > { %709 = vmatpush.bf16.xpose.msra.mxu2 %v1511_v45  ;;  %1081 = vmatpush.bf16.xpose.msra.mxu3 %v1511_v45  ;;  %v516_v45 = vadd.f32 %v1522_v62, %v515_v43 }
 0x161   : > { %v694_v46 = vpack.c.bf16 %v516_v45, %v514_v44 }
 0x167   : > { %710 = vmatpush.bf16.xpose.msra.mxu2 %v1506_v39  ;;  %1082 = vmatpush.bf16.xpose.msra.mxu3 %v1506_v39  ;;  %v518_v39 = vpop.f32.mrf.mxu0 }
 0x168   : > { %v519_v48 = vadd.f32 %v1522_v62, %v518_v39 }
 0x16f   : > { %711 = vmatpush.bf16.xpose.msra.mxu2 %v1501_v33  ;;  %1083 = vmatpush.bf16.xpose.msra.mxu3 %v1501_v33  ;;  %v520_v47 = vpop.f32.mrf.mxu0 }
 0x170   : > { %v521_v49 = vadd.f32 %v1522_v62, %v520_v47 }
 0x172   : > { %v695_v33 = vpack.c.bf16 %v521_v49, %v519_v48 }
 0x176   : > { %712 = vmatmul.bf16.vlgmr.msra.gmra.mxu2 %v688_v3  ;;  %737 = vmatmul.bf16.vlgmr.msra.gmra.mxu3 %v693_v42 }
 0x186   : > { %717 = vmatmul.bf16.gmra.mxu2 %v689_v10  ;;  %742 = vmatmul.bf16.gmra.mxu3 %v694_v46 }
 0x196   : > { %722 = vmatmul.bf16.gmra.mxu2 %v690_v21  ;;  %747 = vmatmul.bf16.gmra.mxu3 %v695_v33 }
 0x1a6   : > { %727 = vmatmul.bf16.gmra.mxu2 %v691_v32 }
 0x1b6   : > { %732 = vmatmul.bf16.gmra.mxu2 %v692_v29 }
 0x1f9   : > { %v713_v50 = vpop.f32.mrf.mxu2  ;;  %v738_v51 = vpop.f32.mrf.mxu3 }
 0x1fa   : > { %753 = vst [vmem:[%s1555_s8] sm:$0xff] %v713_v50 }
 0x1fb   : > { %763 = vst [vmem:[%s1555_s8 + $0x50] sm:$0xff] %v738_v51 }
 0x201   : > { %v715_v52 = vpop.f32.mrf.mxu2  ;;  %v740_v53 = vpop.f32.mrf.mxu3 }
 0x202   : > { %754 = vst [vmem:[%s1555_s8 + $0x8] sm:$0xff] %v715_v52 }
 0x203   : > { %764 = vst [vmem:[%s1555_s8 + $0x58] sm:$0xff] %v740_v53 }
 0x209   : > { %v718_v54 = vpop.f32.mrf.mxu2  ;;  %v743_v55 = vpop.f32.mrf.mxu3 }
 0x20a   : > { %755 = vst [vmem:[%s1555_s8 + $0x10] sm:$0xff] %v718_v54 }
 0x20b   : > { %765 = vst [vmem:[%s1555_s8 + $0x60] sm:$0xff] %v743_v55 }
 0x211   : > { %v720_v56 = vpop.f32.mrf.mxu2  ;;  %v745_v57 = vpop.f32.mrf.mxu3 }
 0x212   : > { %756 = vst [vmem:[%s1555_s8 + $0x18] sm:$0xff] %v720_v56 }
 0x213   : > { %766 = vst [vmem:[%s1555_s8 + $0x68] sm:$0xff] %v745_v57 }
 0x219   : > { %v723_v58 = vpop.f32.mrf.mxu2  ;;  %v748_v59 = vpop.f32.mrf.mxu3 }
 0x21a   : > { %757 = vst [vmem:[%s1555_s8 + $0x20] sm:$0xff] %v723_v58 }
 0x21b   : > { %767 = vst [vmem:[%s1555_s8 + $0x70] sm:$0xff] %v748_v59 }
 0x221   : > { %v725_v60 = vpop.f32.mrf.mxu2  ;;  %v750_v61 = vpop.f32.mrf.mxu3 }
 0x222   : > { %758 = vst [vmem:[%s1555_s8 + $0x28] sm:$0xff] %v725_v60 }
 0x223   : > { %768 = vst [vmem:[%s1555_s8 + $0x78] sm:$0xff] %v750_v61 }
 0x229   : > { %v728_v62 = vpop.f32.mrf.mxu2 }
 0x22a   : > { %759 = vst [vmem:[%s1555_s8 + $0x30] sm:$0xff] %v728_v62 }
 0x231   : > { %v730_v63 = vpop.f32.mrf.mxu2 }
 0x232   : > { %760 = vst [vmem:[%s1555_s8 + $0x38] sm:$0xff] %v730_v63 }
 0x239   : > { %v733_v0 = vpop.f32.mrf.mxu2 }
 0x23a   : > { %761 = vst [vmem:[%s1555_s8 + $0x40] sm:$0xff] %v733_v0 }
 0x241   : > { %v735_v1 = vpop.f32.mrf.mxu2 }
 0x242   : > { %762 = vst [vmem:[%s1555_s8 + $0x48] sm:$0xff] %v735_v1 }
 0x243   : > { %1203 = shalt.err (!%p1200_p10)
}
 0x244   : > { %s1288_s1 = smov 128   ;;  %s1289_s8 = smov 256  }
 0x245   : > { %s1290_s10 = smov 8  }
 0x246   : > { %1084 = dma.vmem_to_hbm [thread:$0]  (%p1388_p5), %s787_s19, 2048, %s789_s7, %s770_s24, %s1288_s1, %s1289_s8, %s1290_s10  }
 0x247 PF: > { %p1090_p11 = scmp.ge.s32.totalorder %s1286_s30, 2  ;;  %s803_s14 = sand.u32 1, %s1250_s21  }
 0x248   : > { %s804_s17 = scalar_lea.sflag [#allocation3], %s803_s14 }
 0x249   : > { %p1087_p12 = pnand %p1090_p11, %p1395_p7 }
 0x24b   : > { %p1088_p13 = pneg %p1087_p12 }
 0x24d   : > { %1245 = dma.done.wait (%p1088_p13), %s804_s17, 2048  }
 0x24e   : > { %1247 = vsyncadd (%p1088_p13), %s804_s17, 4294965248  ;;  %s19_s30 = sadd.s32 1, %s1286_s30   ;;  %s1649_s24 = sld [smem:[#allocation5_spill]] }
 0x24f   : > { %p16_p0 = scmp.ge.s32.totalorder %s19_s30, 10   ;;  %s1650_s25 = sld [smem:[#allocation6_spill]] }
 0x250   : > { %s1651_s26 = sld [smem:[#allocation7_spill]]  ;;  %s1655_s21 = smov %s1254_s22 }
 0x251   : > { %s1652_s27 = sld [smem:[#allocation8_spill]]  ;;  %s1656_s22 = smov %s1258_s23 }
 0x252   : > { %s1653_s28 = sld [smem:[#allocation9_spill]]  ;;  %s1657_s23 = smov %s1411_s20 }
 0x253   : > { %s1654_s29 = sld [smem:[#allocation10_spill]]  ;;  %18 = sbr.rel (!%p16_p0) target bundleno = 8 (0x8), region = 82 }
 0x258   :  { %810 = vsyncpa [#allocation3], 1 }
 0x259   :  { %812 = vsyncpa [#allocation3 + $0x1], 1 }

</bundles_post_ra>
